<compile_context>
chip_gen: v7x
topology: tpu7x:2x2x1
jax: 0.10.0
libtpu: 0.0.40
codegen_flags: <defaults>
</compile_context>

<pallas_src>
import functools

import jax
import jax.numpy as jnp
from jax.experimental import pallas as pl
from jax.experimental.pallas import tpu as pltpu

BN_EPS = 1e-5


def _srm_kernel(x_ref, w0t_ref, w1t_ref, bias_ref, out_ref, *, inv_n, inv_nm1):
    """One grid step over a (bb, C, HW) slab of batch rows.

    w0t/w1t : (C, C) conv taps (mean / std path), pre-scaled by
              gamma * rsqrt(rvar + eps) / 6
    bias    : (1, C) = (beta - rmean*scale)/6 + 0.5
    so the gate is simply clip(mean @ w0t + std @ w1t + bias, 0, 1).
    """
    x = x_ref[...].astype(jnp.float32)                    # (bb, C, HW) f32

    # Channel statistics — centered two-pass variance (slab already resident).
    mean = jnp.sum(x, axis=-1) * inv_n                    # (bb, C)
    d = x - mean[..., None]
    var = jnp.sum(d * d, axis=-1) * inv_nm1               # unbiased (ddof=1)
    std = jnp.sqrt(var)                                   # (bb, C)

    # Fused Conv2d(k=(1,2)) + eval-mode BN + hardsigmoid affine: two tiny
    # matmuls on resident (C, C) taps; no lane-axis concat needed.
    z = (jnp.dot(mean, w0t_ref[...], preferred_element_type=jnp.float32)
         + jnp.dot(std, w1t_ref[...], preferred_element_type=jnp.float32)
         + bias_ref[...])
    g = jnp.clip(z, 0.0, 1.0)                             # hardsigmoid (folded)

    # Recalibrate.
    out_ref[...] = (x * g[..., None]).astype(out_ref.dtype)


def _vmem_capacity_bytes():
    """Generation-aware physical VMEM size; 64 MiB fallback (== v7x, smallest)."""
    try:
        cap = getattr(pltpu.get_tpu_info(), "vmem_capacity_bytes", None)
        if cap:
            return int(cap)
    except Exception:
        pass
    return 64 << 20


def _pick_block_rows(b, max_rows_by_budget):
    """Largest bb | b within the VMEM budget, preferring >=4 (even) grid steps:
    dual-TC chips (v7x) then get >=2 pipelined steps per core, and single-TC
    chips (v5e/v6e) keep DMA/compute overlap without shrinking blocks much."""
    divisors = [d for d in range(1, b + 1) if b % d == 0]
    fitting = [d for d in divisors if d <= max_rows_by_budget] or [1]
    for pred in (lambda g: g >= 4 and g % 2 == 0,
                 lambda g: g >= 4,
                 lambda g: g >= 2 and g % 2 == 0,
                 lambda g: g >= 2):
        ok = [d for d in fitting if pred(b // d)]
        if ok:
            return max(ok)
    return max(fitting)


def srm_forward(x, conv_w, bn_gamma, bn_beta, bn_rmean, bn_rvar):
    """x: (B, C, H, W). conv_w: (C, C, 1, 2). BN params: (C,).

    HBM I/O stays in x.dtype (bf16 inputs are streamed as bf16 and cast to
    f32 per block inside the kernel); all compute is f32.
    """
    b, c, h, w = x.shape
    hw = h * w

    # Flatten spatial dims onto the lane axis (free reshape, no pad, no cast).
    x_flat = x.reshape(b, c, hw)

    # Fold eval-mode BN and the hardsigmoid affine into the conv taps.
    # TODO(synk): training-mode BatchNorm (batch stats + running-stat update)
    # is not implemented; eval-mode semantics are used.
    scale = (bn_gamma / jnp.sqrt(bn_rvar + BN_EPS)).astype(jnp.float32)          # (C,)
    w0t = conv_w[:, :, 0, 0].T.astype(jnp.float32) * (scale / 6.0)[None, :]      # (C, C)
    w1t = conv_w[:, :, 0, 1].T.astype(jnp.float32) * (scale / 6.0)[None, :]      # (C, C)
    bias = ((bn_beta - bn_rmean * scale) / 6.0 + 0.5).reshape(1, c).astype(jnp.float32)

    # ---- generation-aware VMEM budgeting -----------------------------------
    vmem_cap = _vmem_capacity_bytes()                     # 64 MiB (v7x) / 128 MiB (v5e/v6e)
    vmem_limit = int(min(vmem_cap - (12 << 20), int(vmem_cap * 0.8)))
    block_budget = max(vmem_limit - (8 << 20), 4 << 20)   # headroom: weights + Mosaic scratch

    # VMEM footprint per batch row: sublane-padded C, lane-padded HW;
    # 2x double-buffered input + 2x output blocks (x.dtype) plus ~3 f32
    # elementwise temporaries (f32 cast, centered diff, gated product) in case
    # Mosaic does not fuse them.
    c_pad = -(-c // 8) * 8
    hw_pad = -(-hw // 128) * 128
    io_bytes = x.dtype.itemsize
    bytes_per_row = c_pad * hw_pad * (4 * io_bytes + 3 * 4)

    max_rows = max(1, block_budget // bytes_per_row)
    bb = _pick_block_rows(b, max_rows)
    # TODO(synk): add an HW-tiled two-pass fallback (second "arbitrary" grid
    # axis carrying s1/s2 in scratch) for feature maps where even a single
    # (1, C, HW) row exceeds the per-block budget (soonest on v7x's 64 MiB).

    inv_n = 1.0 / hw
    inv_nm1 = 1.0 / (hw - 1) if hw > 1 else float("nan")  # torch: NaN std at hw==1

    kernel = functools.partial(_srm_kernel, inv_n=inv_n, inv_nm1=inv_nm1)

    # Note: input_output_aliases={0: 0} would only save an HBM allocation, but
    # risks a defensive device copy when the caller's x is not donated, so it
    # is intentionally not used here.
    out_flat = pl.pallas_call(
        kernel,
        out_shape=jax.ShapeDtypeStruct((b, c, hw), x.dtype),
        grid_spec=pltpu.PrefetchScalarGridSpec(
            num_scalar_prefetch=0,
            grid=(b // bb,),
            in_specs=[
                pl.BlockSpec((bb, c, hw), lambda i: (i, 0, 0)),   # x slab
                pl.BlockSpec((c, c), lambda i: (0, 0)),           # fused mean tap
                pl.BlockSpec((c, c), lambda i: (0, 0)),           # fused std tap
                pl.BlockSpec((1, c), lambda i: (0, 0)),           # fused bias
            ],
            out_specs=pl.BlockSpec((bb, c, hw), lambda i: (i, 0, 0)),
        ),
        compiler_params=pltpu.CompilerParams(
            dimension_semantics=("parallel",),
            vmem_limit_bytes=vmem_limit),
    )(x_flat, w0t, w1t, bias)

    return out_flat.reshape(b, c, h, w)


def _srm_reference(x, conv_w, bn_gamma, bn_beta, bn_rmean, bn_rvar):
    """Pure-JAX reference implementing the torch forward (eval-mode BN)."""
    b, c, h, w = x.shape
    xf = x.reshape(b, c, -1).astype(jnp.float32)
    mean = xf.mean(-1)                                     # (B, C)
    std = jnp.sqrt(((xf - mean[..., None]) ** 2).sum(-1) / (h * w - 1))
    w0 = conv_w[:, :, 0, 0]
    w1 = conv_w[:, :, 0, 1]
    z = mean @ w0.T + std @ w1.T                           # (B, C)
    z = (z - bn_rmean) / jnp.sqrt(bn_rvar + BN_EPS) * bn_gamma + bn_beta
    g = jnp.clip(z / 6.0 + 0.5, 0.0, 1.0)
    return x * g[:, :, None, None].astype(x.dtype)


if __name__ == "__main__":
    def _run_case(key, shape):
        b_, c_, h_, w_ = shape
        kx, kw, kg, kb, km, kv = jax.random.split(key, 6)
        x = jax.random.normal(kx, (b_, c_, h_, w_), dtype=jnp.float32)
        # Conv2d(C, C, kernel_size=(1,2), bias=False) -> weight (C, C, 1, 2)
        conv_w = 0.1 * jax.random.normal(kw, (c_, c_, 1, 2), dtype=jnp.float32)
        # Non-trivial BN params to exercise the weight/bias folding.
        bn_gamma = 1.0 + 0.1 * jax.random.normal(kg, (c_,), dtype=jnp.float32)
        bn_beta = 0.1 * jax.random.normal(kb, (c_,), dtype=jnp.float32)
        bn_rmean = 0.1 * jax.random.normal(km, (c_,), dtype=jnp.float32)
        bn_rvar = 0.5 + jnp.abs(jax.random.normal(kv, (c_,), dtype=jnp.float32))

        out = jax.block_until_ready(
            srm_forward(x, conv_w, bn_gamma, bn_beta, bn_rmean, bn_rvar))
        ref = _srm_reference(x, conv_w, bn_gamma, bn_beta, bn_rmean, bn_rvar)
        assert out.shape == (b_, c_, h_, w_)
        assert jnp.allclose(out, ref, atol=2e-5, rtol=2e-5), f"mismatch at {shape}"

    key = jax.random.PRNGKey(0)
    k1, k2 = jax.random.split(key)
    _run_case(k1, (2, 4, 16, 16))   # primary shape
    _run_case(k2, (2, 4, 7, 9))     # non-128-multiple spatial: exercises the no-pad path

    print("KERNEL_OK")
</pallas_src>

<mosaic_0001>
module attributes {stable_mosaic.version = 11 : i64} {
  func.func @_srm_kernel(%arg0: i32, %arg1: memref<1x4x256xf32, #tpu.memory_space<vmem>>, %arg2: memref<4x4xf32, #tpu.memory_space<vmem>>, %arg3: memref<4x4xf32, #tpu.memory_space<vmem>>, %arg4: memref<1x4xf32, #tpu.memory_space<vmem>>, %arg5: memref<1x4x256xf32, #tpu.memory_space<vmem>>) attributes {dimension_semantics = [#tpu.dimension_semantics<parallel>], iteration_bounds = array<i64: 2>, scalar_prefetch = 0 : i64, scratch_operands = 0 : i64, tpu.core_type = #tpu.core_type<tc>, window_params = [{transform_indices = @transform_0, window_bounds = array<i64: 1, 4, 256>}, {pipeline_mode = #tpu.pipeline_mode<synchronous>, transform_indices = @transform_1, window_bounds = array<i64: 4, 4>}, {pipeline_mode = #tpu.pipeline_mode<synchronous>, transform_indices = @transform_2, window_bounds = array<i64: 4, 4>}, {pipeline_mode = #tpu.pipeline_mode<synchronous>, transform_indices = @transform_3, window_bounds = array<i64: 1, 4>}, {transform_indices = @transform_4, window_bounds = array<i64: 1, 4, 256>}]} {
    %c0 = arith.constant 0 : index
    %c0_0 = arith.constant 0 : index
    %c0_1 = arith.constant 0 : index
    %0 = vector.load %arg1[%c0, %c0_0, %c0_1] : memref<1x4x256xf32, #tpu.memory_space<vmem>>, vector<1x4x256xf32>
    %cst = arith.constant dense<0.000000e+00> : vector<1x4xf32>
    %1 = vector.multi_reduction <add>, %0, %cst [2] : vector<1x4x256xf32> to vector<1x4xf32>
    %cst_2 = arith.constant 3.906250e-03 : f32
    %2 = vector.broadcast %cst_2 : f32 to vector<1x4xf32>
    %3 = arith.mulf %1, %2 : vector<1x4xf32>
    %4 = vector.shape_cast %3 : vector<1x4xf32> to vector<1x4x1xf32>
    %5 = vector.broadcast %4 : vector<1x4x1xf32> to vector<1x4x256xf32>
    %6 = arith.subf %0, %5 : vector<1x4x256xf32>
    %7 = arith.mulf %6, %6 : vector<1x4x256xf32>
    %cst_3 = arith.constant dense<0.000000e+00> : vector<1x4xf32>
    %8 = vector.multi_reduction <add>, %7, %cst_3 [2] : vector<1x4x256xf32> to vector<1x4xf32>
    %cst_4 = arith.constant 0.00392156886 : f32
    %9 = vector.broadcast %cst_4 : f32 to vector<1x4xf32>
    %10 = arith.mulf %8, %9 : vector<1x4xf32>
    %11 = math.sqrt %10 : vector<1x4xf32>
    %c0_5 = arith.constant 0 : index
    %c0_6 = arith.constant 0 : index
    %12 = vector.load %arg2[%c0_5, %c0_6] : memref<4x4xf32, #tpu.memory_space<vmem>>, vector<4x4xf32>
    %cst_7 = arith.constant dense<0.000000e+00> : vector<1x4xf32>
    %13 = tpu.matmul %3, %12, %cst_7 {dimension_numbers = #tpu.dot_dimension_numbers<[1], [0], [0], [1], [0, 0, 1, 1], [], []>} : vector<1x4xf32>, vector<4x4xf32>, vector<1x4xf32> -> vector<1x4xf32>
    %c0_8 = arith.constant 0 : index
    %c0_9 = arith.constant 0 : index
    %14 = vector.load %arg3[%c0_8, %c0_9] : memref<4x4xf32, #tpu.memory_space<vmem>>, vector<4x4xf32>
    %cst_10 = arith.constant dense<0.000000e+00> : vector<1x4xf32>
    %15 = tpu.matmul %11, %14, %cst_10 {dimension_numbers = #tpu.dot_dimension_numbers<[1], [0], [0], [1], [0, 0, 1, 1], [], []>} : vector<1x4xf32>, vector<4x4xf32>, vector<1x4xf32> -> vector<1x4xf32>
    %16 = arith.addf %13, %15 : vector<1x4xf32>
    %c0_11 = arith.constant 0 : index
    %c0_12 = arith.constant 0 : index
    %17 = vector.load %arg4[%c0_11, %c0_12] : memref<1x4xf32, #tpu.memory_space<vmem>>, vector<1x4xf32>
    %18 = arith.addf %16, %17 : vector<1x4xf32>
    %cst_13 = arith.constant 0.000000e+00 : f32
    %cst_14 = arith.constant 1.000000e+00 : f32
    %19 = vector.broadcast %cst_13 : f32 to vector<1x4xf32>
    %20 = arith.maximumf %19, %18 : vector<1x4xf32>
    %21 = vector.broadcast %cst_14 : f32 to vector<1x4xf32>
    %22 = arith.minimumf %21, %20 : vector<1x4xf32>
    %23 = vector.shape_cast %22 : vector<1x4xf32> to vector<1x4x1xf32>
    %24 = vector.broadcast %23 : vector<1x4x1xf32> to vector<1x4x256xf32>
    %25 = arith.mulf %0, %24 : vector<1x4x256xf32>
    %c0_15 = arith.constant 0 : index
    %c0_16 = arith.constant 0 : index
    %c0_17 = arith.constant 0 : index
    %26 = vector.load %arg5[%c0_15, %c0_16, %c0_17] : memref<1x4x256xf32, #tpu.memory_space<vmem>>, vector<1x4x256xf32>
    tpu.vector_store %arg5[%c0_15, %c0_16, %c0_17], %25 {strides = array<i32>} : memref<1x4x256xf32, #tpu.memory_space<vmem>>, vector<1x4x256xf32>,
    return
  }
  func.func @transform_0(%arg0: i32) -> (i32, i32, i32) {
    %c0_i32 = arith.constant 0 : i32
    %c0_i32_0 = arith.constant 0 : i32
    %c0_i32_1 = arith.constant 0 : i32
    return %arg0, %c0_i32, %c0_i32_0 : i32, i32, i32
  }
  func.func @transform_1(%arg0: i32) -> (i32, i32) {
    %c0_i32 = arith.constant 0 : i32
    %c0_i32_0 = arith.constant 0 : i32
    %c0_i32_1 = arith.constant 0 : i32
    return %c0_i32, %c0_i32_0 : i32, i32
  }
  func.func @transform_2(%arg0: i32) -> (i32, i32) {
    %c0_i32 = arith.constant 0 : i32
    %c0_i32_0 = arith.constant 0 : i32
    %c0_i32_1 = arith.constant 0 : i32
    return %c0_i32, %c0_i32_0 : i32, i32
  }
  func.func @transform_3(%arg0: i32) -> (i32, i32) {
    %c0_i32 = arith.constant 0 : i32
    %c0_i32_0 = arith.constant 0 : i32
    %c0_i32_1 = arith.constant 0 : i32
    return %c0_i32, %c0_i32_0 : i32, i32
  }
  func.func @transform_4(%arg0: i32) -> (i32, i32, i32) {
    %c0_i32 = arith.constant 0 : i32
    %c0_i32_0 = arith.constant 0 : i32
    %c0_i32_1 = arith.constant 0 : i32
    return %arg0, %c0_i32, %c0_i32_0 : i32, i32, i32
  }
}

</mosaic_0001>

<bundles_post_ra>
// kernel: tpu_custom_call.1
= control target key start
LH: loop header
LB: loop body
LE: loop exit
PB: predicated region body
PF: predicated region fallthrough
CT: control target
= control target key end

     0   :  { %9 = vsyncpa [#allocation3], 0  ;;  %s1032_s0 = inlined_call_operand.hbm [shape: f32[2,4,256], index: 0, kind: input, shape index: {}]   ;;  %s1033_s1 = inlined_call_operand.hbm [shape: f32[4,4], index: 1, kind: input, shape index: {}]   ;;  %s1034_s2 = inlined_call_operand.vmem [shape: f32[4,4], index: 2, kind: input, shape index: {}]   ;;  %s1035_s3 = inlined_call_operand.vmem [shape: f32[1,4], index: 3, kind: input, shape index: {}]   ;;  %s1036_s4 = inlined_call_operand.hbm [shape: f32[2,4,256], index: 4, kind: output, shape index: {}]  }
   0x1   :  { %11 = vsyncpa [#allocation3 + $0x1], 0 }
   0x2   :  { %12 = vsyncpa [#allocation6], 0 }
   0x3   :  { %13 = vsyncpa [#allocation4], 0 }
   0x4   :  { %15 = vsyncpa [#allocation4 + $0x1], 0  ;;  %s806_s15 = smov 0   ;;  %s808_s16 = smov 0  }
   0x5   :  { %s810_s17 = smov 0   ;;  %s812_s18 = smov 0  }
   0x6 LB: > { %s827_s19 = sadd.s32 4294967295, %s773_s18   ;;  %s546_s20 = sadd.s32 4294967294, %s773_s18   ;;  %s773_s18 = sphi %s812_s18, %s1060_s18   ;;  %s769_s17 = sphi %s810_s17, %s1059_s17   ;;  %s765_s16 = sphi %s808_s16, %s1058_s16   ;;  %s761_s15 = sphi %s806_s15, %s1057_s15  }
   0x7   : > { %p41_p0 = scmp.ne.s32.totalorder %s765_s16, %s761_s15  ;;  %p1037_p1 = scmp.eq.s32.totalorder %s827_s19, 0 }
   0x8   : > { %p134_p3 = scmp.eq.s32.totalorder %s546_s20, 1  ;;  %p547_p5 = scmp.ge.s32.totalorder %s773_s18, 1 }
   0x9   : > { %p836_p4 = por %p1037_p1, %p41_p0  ;;  %p141_p7 = scmp.lt.s32.totalorder %s773_s18, 3 }
   0xa   : > { %p841_p6 = por %p134_p3, %p41_p0  ;;  %s775_s24 = smov [#allocation5]  }
   0xb   : > { %s1040_s21 = scalar_select %p836_p4, 1, 0 }
   0xc   : > { %s1041_s22 = scalar_select %p841_p6, 1, 0 }
   0xd   : > { %p846_p8 = pnand %p547_p5, %p141_p7  ;;  %s154_s25 = sshll.u32 %s775_s24, 4  ;;  %s155_s25 = int_to_ptr.vmem [resolvable:$true] %s154_s25 }
   0xe   : > { %s854_s26 = sadd.s32 1, %s773_s18   ;;  %s28_s30 = sadd.s32 1, %s769_s17 }
   0xf   : > { %s1042_s23 = scalar_select %p846_p8, 1, 0 }
  0x10   : > { %p590_p10 = pneg %p846_p8  ;;  %s25_s28 = ssub.s32 %s773_s18, %s854_s26 }
  0x11   : > { %p864_p12 = scmp.eq.s32.totalorder %s25_s28, 0  ;;  %s645_s7 = scalar_lea.hbm %s1033_s1, 64 }
  0x12   : > { %p858_p11 = pnand %p590_p10, %p1037_p1  ;;  %p646_p0 = scmp.ne.s32.totalorder %s1033_s1, %s645_s7 }
  0x13   : > { %s1044_s29 = scalar_select %p864_p12, 1, 0 }
  0x14   : > { %p647_p3 = pneg %p858_p11  ;;  %p652_p10 = scmp.lt.u32.totalorder %s645_s7, %s1033_s1 }
  0x16   : > { %p648_p5 = pnand %p647_p3, %p646_p0 }
  0x18   : > { %p649_p7 = pneg %p648_p5 }
  0x1a   : > { %p654_p9 = pnand %p652_p10, %p649_p7 }
  0x1c   : > { %657 = shalt.err (!%p654_p9)
}
  0x1d   : > { %s658_s12 = scalar_lea.vmem %s155_s25, 64  ;;  %p666_p6 = scmp.lt.s32.totalorder %s155_s25, %s155_s25 }
  0x1e   : > { %p659_p1 = scmp.ne.s32.totalorder %s155_s25, %s658_s12  ;;  %p667_p4 = scmp.lt.s32.totalorder %s658_s12, %s658_s12 }
  0x20   : > { %p661_p2 = pnand %p659_p1, %p647_p3  ;;  %p668_p8 = por %p667_p4, %p666_p6 }
  0x22   : > { %p662_p13 = pneg %p661_p2 }
  0x24   : > { %p669_p12 = pnand %p668_p8, %p662_p13 }
  0x26   : > { %672 = shalt.err (!%p669_p12)
}
  0x27   : > { %593 = dma.hbm_to_vmem [thread:$0]  (!%p858_p11), %s1033_s1, 64, %s155_s25, [#allocation6]  }
  0x28   : > { %p1045_p1 = scmp.ne.s32.totalorder %s1044_s29, 0  ;;  %p36_p2 = scmp.eq.s32.totalorder %s773_s18, 0 }
  0x29   : > { %p1046_p4 = scmp.ne.s32.totalorder %s769_s17, %s765_s16  ;;  %p1047_p6 = scmp.eq.s32.totalorder %s827_s19, 1 }
  0x2a   : > { %s890_s20 = scalar_select %p1045_p1, %s769_s17, %s28_s30  }
  0x2b   : > { %p898_p8 = por %p1047_p6, %p1046_p4  ;;  %p603_p9 = scmp.lt.s32.totalorder %s773_s18, 2 }
  0x2c   : > { %s171_s27 = sand.u32 1, %s769_s17   ;;  %p1049_p12 = pmov %p1046_p4 }
  0x2d   : > { %s550_s28 = sshll.u32 %s171_s27, 3  ;;  %s566_s5 = sshll.u32 %s773_s18, 7 }
  0x2e   : > { %p37_p13 = por %p36_p2, %p1049_p12  ;;  %s911_s25 = scalar_lea.hbm %s1032_s0, %s566_s5 }
  0x2f   : > { %s175_s29 = scalar_lea.vmem [#allocation2], %s550_s28  ;;  %s172_s9 = scalar_lea.sflag [#allocation3], %s171_s27 }
  0x30   : > { %s183_s30 = sshll.u32 %s175_s29, 4  ;;  %p913_p11 = pnand %p603_p9, %p37_p13  ;;  %s917_s30 = int_to_ptr.vmem [resolvable:$true] %s183_s30 }
  0x31   : > { %s673_s10 = scalar_lea.hbm %s911_s25, 128  ;;  %s678_s13 = scalar_lea.hbm %s1032_s0, 256 }
  0x32   : > { %p674_p0 = scmp.ne.s32.totalorder %s911_s25, %s673_s10  ;;  %p675_p3 = pneg %p913_p11 }
  0x33   : > { %p679_p10 = scmp.lt.u32.totalorder %s911_s25, %s1032_s0  ;;  %p680_p1 = scmp.lt.u32.totalorder %s678_s13, %s673_s10 }
  0x34   : > { %p676_p5 = pnand %p675_p3, %p674_p0  ;;  %p682_p4 = scmp.lt.u32.totalorder %s673_s10, %s911_s25 }
  0x35   : > { %p681_p2 = por %p680_p1, %p679_p10 }
  0x36   : > { %p677_p7 = pneg %p676_p5 }
  0x37   : > { %p683_p6 = por %p682_p4, %p681_p2 }
  0x39   : > { %p684_p9 = pnand %p683_p6, %p677_p7 }
  0x3b   : > { %687 = shalt.err (!%p684_p9)
}
  0x3c   : > { %s688_s27 = scalar_lea.vmem %s917_s30, 128  ;;  %s776_s5 = smov [#allocation2]  }
  0x3d   : > { %p689_p12 = scmp.ne.s32.totalorder %s917_s30, %s688_s27  ;;  %s693_s6 = sshll.u32 %s776_s5, 4  ;;  %s694_s6 = int_to_ptr.vmem [resolvable:$false] %s693_s6 }
  0x3e   : > { %s695_s7 = scalar_lea.vmem %s694_s6, 256  ;;  %p696_p5 = scmp.lt.s32.totalorder %s917_s30, %s694_s6 }
  0x3f   : > { %p691_p13 = pnand %p689_p12, %p675_p3  ;;  %p697_p10 = scmp.lt.s32.totalorder %s695_s7, %s688_s27 }
  0x41   : > { %p692_p0 = pneg %p691_p13  ;;  %p698_p1 = por %p697_p10, %p696_p5 }
  0x43   : > { %p699_p2 = pnand %p698_p1, %p692_p0 }
  0x45   : > { %702 = shalt.err (!%p699_p2)
}
  0x46   : > { %597 = dma.hbm_to_vmem [thread:$0]  (!%p913_p11), %s911_s25, 128, %s917_s30, %s172_s9  }
  0x47   : > { %p1051_p7 = scmp.ne.s32.totalorder %s1042_s23, 0 }
  0x48   : > { %s947_s29 = sand.u32 (!%p1051_p7), 1, %s765_s16   ;;  %p1052_p3 = scmp.ne.s32.totalorder (!%p1051_p7), %s1040_s21, 0 }
  0x49   : > { %192 = sbr.rel (%p1051_p7) target bundleno = 761 (0x2f9), region = 36  ;;  %s554_s10 = sshll.u32 (!%p1051_p7), %s947_s29, 3 }
  0x4a   : > { %s195_s11 = scalar_lea.sflag (!%p1051_p7), [#allocation3], %s947_s29  ;;  %s198_s12 = scalar_lea.vmem (!%p1051_p7), [#allocation2], %s554_s10 }
  0x50   : > { %748 = dma.done.wait (%p1052_p3), %s195_s11, 128  }
  0x51   : > { %750 = vsyncadd (%p1052_p3), %s195_s11, 4294967168  ;;  %p1053_p11 = scmp.eq.s32.totalorder %s827_s19, 0 }
  0x53   : > { %752 = dma.done.wait (%p1053_p11), [#allocation6], 64   ;;  %p1054_p4 = pmov %p1053_p11 }
  0x54   : > { %vm231_vm0 = vcmask 1043456   ;;  %v961_v0 = vld [vmem:[%s198_s12] sm:$0xff]  ;;  %v777_v5 = vmov 0.0   ;;  %v265_v6 = vld [vmem:[#allocation5] sm:$0xf]  ;;  %vm778_vm1 = vmmov 0   ;;  %v242_v9 = vlaneseq }
  0x55   : > { %754 = vsyncadd (%p1054_p4), [#allocation6], 4294967232  ;;  %v229_v1 = vcombine.high %v961_v0, %v961_v0  ;;  %v232_v2 = vsel %vm231_vm0, %v961_v0, 0.0  ;;  %577 = vmatprep.subr.mxu1 %v777_v5  ;;  %572 = vmatprep.subr.mxu0 %v777_v5  ;;  %v779_v7 = vmov 839922192   ;;  %vm274_vm2 = vcmask 31744  }
  0x56   : > { %578 = vmatpush3.msk.msra.mxu1 %vm231_vm0, %v265_v6  ;;  %579 = vmatprep.mubr.msk.f32.mxu1 %vm778_vm1, %v777_v5  ;;  %v240_v8 = vunpack.c.l.s4 %v779_v7  ;;  %v243_v11 = vshrl.u32 %v242_v9, 7  ;;  %v269_v12 = vand.u32 127, %v242_v9  ;;  %v266_v25 = vld [vmem:[%s1034_s2] sm:$0xf]  ;;  %s567_s8 = sshll.u32 %s827_s19, 7  ;;  %s226_s9 = scalar_lea.vmem [#allocation7], %s554_s10 }
  0x57   : > { %v233_v3 = vsel %vm231_vm0, %v229_v1, 0.0  ;;  %574 = vmatprep.mubr.msk.f32.mxu0 %vm778_vm1, %v777_v5  ;;  %573 = vmatpush3.msk.msra.mxu0 %vm231_vm0, %v266_v25  ;;  %v429_v37 = vld [vmem:[%s1035_s3] sm:$0x1]  ;;  %s466_s13 = sshll.u32 %s226_s9, 4  ;;  %s988_s27 = scalar_lea.hbm %s1036_s4, %s567_s8  ;;  %s990_s13 = int_to_ptr.vmem [resolvable:$true] %s466_s13 }
  0x58   : > { %v234_v4 = vadd.f32 %v233_v3, %v232_v2  ;;  %v241_v10 = vunpack.c.0.s8 %v240_v8  ;;  %v272_v14 = vsub.s32 %v269_v12, %v243_v11  ;;  %v435_v42 = vsub.s32 0, %v243_v11  ;;  %s452_s5 = scalar_lea.sflag [#allocation4], %s947_s29  ;;  %s703_s6 = scalar_lea.vmem %s990_s13, 128 }
  0x59   : > { %p704_p6 = scmp.ne.s32.totalorder %s990_s13, %s703_s6  ;;  %s780_s19 = smov [#allocation7]  }
  0x5a   : > { %235 = vadd.xlane.f32.xlu0 %v234_v4  ;;  %v244_v13 = vsub.s32 %v241_v10, %v243_v11  ;;  %s707_s7 = sshll.u32 %s780_s19, 4  ;;  %s708_s7 = int_to_ptr.vmem [resolvable:$false] %s707_s7 }
  0x5b   : > { %p705_p9 = pnand %p704_p6, %p898_p8  ;;  %s709_s10 = scalar_lea.vmem %s708_s7, 256 }
  0x5c   : > { %p710_p13 = scmp.lt.s32.totalorder %s990_s13, %s708_s7  ;;  %p711_p0 = scmp.lt.s32.totalorder %s709_s10, %s703_s6 }
  0x5d   : > { %p706_p12 = pneg %p705_p9 }
  0x5e   : > { %p712_p5 = por %p711_p0, %p710_p13 }
  0x60   : > { %p713_p10 = pnand %p712_p5, %p706_p12 }
  0xe7   : > { %v236_v15 = vpop.xlane.xlu0 %235 }
  0xe8   : > { %v237_v16 = vmul.f32 0.00390625, %v236_v15 }
  0xea   : > { %v245_v17 = vrot.slane %v237_v16, %v244_v13  ;;  %v353_v18 = vrot.slane %v237_v16, %v272_v14 }
  0xec   : > { %v247_v19 = vsub.f32 %v961_v0, %v245_v17  ;;  %580 = vmatmul.mubr.msk.f32.vlgmr.msra.gmra.mrb[0].mxu1 %vm274_vm2, %v353_v18 }
  0xee   : > { %v248_v20 = vmul.f32 %v247_v19, %v247_v19 }
  0xf0   : > { %v250_v21 = vcombine.high %v248_v20, %v248_v20  ;;  %v252_v22 = vsel %vm231_vm0, %v248_v20, 0.0 }
  0xf2   : > { %v253_v23 = vsel %vm231_vm0, %v250_v21, 0.0 }
  0xf3   : > { %v254_v24 = vadd.f32 %v253_v23, %v252_v22 }
  0xf5   : > { %255 = vadd.xlane.f32.xlu0 %v254_v24 }
 0x182   : > { %v256_v26 = vpop.xlane.xlu0 %255 }
 0x183   : > { %v257_v27 = vmul.f32 0.003921569, %v256_v26 }
 0x185   : > { %643 = vrsqrt.f32 %v257_v27  ;;  %vm260_vm3 = vcmp.eq.f32.partialorder %v257_v27, inf  ;;  %v263_v30 = vand.u32 2147483648, %v257_v27  ;;  %vm262_vm4 = vcmp.eq.f32.partialorder %v257_v27, 0.0 }
 0x18f   : > { %v644_v28 = vpop.eup %643 }
 0x190   : > { %v259_v29 = vmul.f32 %v644_v28, %v257_v27 }
 0x192   : > { %v261_v31 = vsel %vm260_vm3, %v257_v27, %v259_v29 }
 0x193   : > { %v264_v32 = vsel %vm262_vm4, %v263_v30, %v261_v31 }
 0x194   : > { %v273_v33 = vrot.slane %v264_v32, %v272_v14 }
 0x196   : > { %575 = vmatmul.mubr.msk.f32.vlgmr.msra.gmra.mrb[0].mxu0 %vm274_vm2, %v273_v33 }
 0x1bf   : > { %v425_v34 = vpop.f32.mrb[0].mxu1 }
 0x1c0   : > { %v581_v35 = vpop.f32.mrb[1].mxu1 }
 0x269   : > { %v346_v36 = vpop.f32.mrb[0].mxu0 }
 0x26a   : > { %v426_v38 = vadd.f32 %v425_v34, %v346_v36  ;;  %v576_v39 = vpop.f32.mrb[1].mxu0 }
 0x26c   : > { %v430_v40 = vadd.f32 %v429_v37, %v426_v38 }
 0x26e   : > { %v431_v41 = vmax.f32 %v430_v40, 0.0 }
 0x270   : > { %v432_v43 = vmin.f32 %v431_v41, 1.0 }
 0x272   : > { %v436_v44 = vrot.slane %v432_v43, %v435_v42 }
 0x274   : > { %438 = vbcast.lane.b32.xlu1 %v436_v44, 256 }
 0x2e6   : > { %v439_v45 = vpop.permute.xlu1 %438 }
 0x2e7   : > { %v447_v46 = vrot.slane %v439_v45, %v244_v13 }
 0x2e9   : > { %v449_v47 = vmul.f32 %v447_v46, %v961_v0 }
 0x2eb   : > { %450 = vst [vmem:[%s226_s9] sm:$0xff] %v449_v47 }
 0x2ec   : > { %716 = shalt.err (!%p713_p10)
}
 0x2ed   : > { %s717_s29 = scalar_lea.hbm %s988_s27, 128  ;;  %s721_s21 = scalar_lea.hbm %s1036_s4, 256 }
 0x2ee   : > { %p718_p1 = scmp.ne.s32.totalorder %s988_s27, %s717_s29  ;;  %p722_p3 = scmp.lt.u32.totalorder %s988_s27, %s1036_s4 }
 0x2ef   : > { %p723_p11 = scmp.lt.u32.totalorder %s721_s21, %s717_s29  ;;  %p725_p6 = scmp.lt.u32.totalorder %s717_s29, %s988_s27 }
 0x2f0   : > { %p719_p2 = pnand %p718_p1, %p898_p8 }
 0x2f1   : > { %p724_p4 = por %p723_p11, %p722_p3 }
 0x2f2   : > { %p720_p7 = pneg %p719_p2 }
 0x2f3   : > { %p726_p9 = por %p725_p6, %p724_p4 }
 0x2f5   : > { %p727_p12 = pnand %p726_p9, %p720_p7 }
 0x2f7   : > { %730 = shalt.err (!%p727_p12)
}
 0x2f8   : > { %588 = dma.vmem_to_hbm [thread:$0]  (%p898_p8), %s990_s13, 128, %s988_s27, %s452_s5  }
 0x2f9 PF: > { %s478_s30 = sand.u32 1, %s761_s15   ;;  %p1055_p13 = scmp.ne.s32.totalorder %s1041_s22, 0 }
 0x2fa   : > { %p1056_p0 = scmp.ge.s32.totalorder %s773_s18, 2  ;;  %s479_s8 = scalar_lea.sflag [#allocation4], %s478_s30 }
 0x2fc   : > { %p599_p5 = pnand %p1056_p0, %p1055_p13 }
 0x2fe   : > { %756 = dma.done.wait (!%p599_p5), %s479_s8, 128  }
 0x2ff   : > { %758 = vsyncadd (!%p599_p5), %s479_s8, 4294967168  ;;  %p18_p10 = scmp.ge.s32.totalorder %s854_s26, 4   ;;  %s1057_s15 = smov %s765_s16 }
 0x300   : > { %s1058_s16 = smov %s769_s17  ;;  %s1059_s17 = smov %s890_s20 }
 0x301   : > { %s1060_s18 = smov %s854_s26  ;;  %20 = sbr.rel (!%p18_p10) target bundleno = 6 (0x6), region = 85 }
 0x308   :  { %484 = vsyncpa [#allocation3], 1 }
 0x309   :  { %486 = vsyncpa [#allocation3 + $0x1], 1 }
 0x30a   :  { %487 = vsyncpa [#allocation6], 1 }
 0x30b   :  { %488 = vsyncpa [#allocation4], 1 }
 0x30c   :  { %490 = vsyncpa [#allocation4 + $0x1], 1 }

</bundles_post_ra>
